<compile_context>
chip_gen: v7x
topology: tpu7x:2x2x1
jax: 0.10.0
libtpu: 0.0.40
codegen_flags: <defaults>
</compile_context>

<pallas_src>
import jax
import jax.numpy as jnp
from jax.experimental import pallas as pl
from jax.experimental.pallas import tpu as pltpu

_LANE = 128
_SUBLANE = 8
_MIN_PALLAS_BATCH = 8     # below this the tile doesn't even fill a vreg's sublanes
_MERGE_WIDTH = 256        # adjacent modalities narrower than this get pre-merged


def _round_up(x, m):
    return ((x + m - 1) // m) * m


def _concat_kernel(*refs):
    """refs = (in_ref_0, ..., in_ref_{n-1}, out_ref).

    Each in_ref_i is a (TB, F_i) VMEM tile; out_ref is (TB, sum_i F_i).
    Every modality tile is copied into its static, contiguous column range of
    the output tile (offsets are Python ints -> static slices).
    """
    # TODO(synk): on v7x, DMAing each input tile straight into an HBM output
    # (out_specs memory_space=pl.ANY + pltpu.make_async_copy) would avoid
    # masked vst.msk stores for non-128-aligned column offsets and free the
    # output's VMEM double-buffer; kept the portable VMEM splice here.
    n = len(refs) - 1
    in_refs = refs[:n]
    out_ref = refs[n]
    off = 0
    for r in in_refs:
        f = r.shape[1]
        out_ref[:, off:off + f] = r[...].astype(out_ref.dtype)
        off += f


def _vmem_budget():
    """(vmem_limit_bytes, tile_budget_bytes) — consistent, generation-aware."""
    try:
        cap = int(pltpu.get_tpu_info().vmem_capacity_bytes)
    except Exception:
        cap = 64 * 1024 * 1024  # conservative fallback (v7x physical)
    # Requested scoped limit: never above 64 MiB, never above 75% of physical
    # (v7x: 48 MiB of its 64 MiB; v5e/v6e: 64 MiB of their 128 MiB).
    vmem_limit = min(64 * 1024 * 1024, (cap * 3) // 4)
    # Tile budget (all double-buffered tiles) leaves ~10% headroom under it.
    tile_budget = (vmem_limit * 9) // 10
    return vmem_limit, tile_budget


def _pick_batch_tile(batch, db_row_bytes, tile_budget):
    """Largest multiple-of-8 batch tile whose double-buffered tiles fit, with
    the grid kept at >= 2 steps (prefer >= 4) so pipelining / megacore stay on."""
    tb = tile_budget // max(db_row_bytes, 1)
    tb = (tb // _SUBLANE) * _SUBLANE
    tb = max(tb, _SUBLANE)
    b_rounded = _round_up(batch, _SUBLANE)
    tb = min(tb, b_rounded)
    if b_rounded >= 2 * _SUBLANE:
        # Aim for ~4 grid steps (2 when the batch is too small for 4).
        tb = min(tb, _round_up(pl.cdiv(batch, 4), _SUBLANE))
    return max(tb, _SUBLANE)


def _merge_narrow(flat, out_dtype):
    """Pre-merge runs of adjacent narrow modalities; order is preserved."""
    merged = []
    pending = []
    pending_w = 0

    def _flush():
        nonlocal pending, pending_w
        if not pending:
            return
        if len(pending) == 1:
            merged.append(pending[0])
        else:
            merged.append(
                jnp.concatenate([p.astype(out_dtype) for p in pending], axis=1))
        pending = []
        pending_w = 0

    for f in flat:
        w = f.shape[1]
        if w < _MERGE_WIDTH:
            pending.append(f)
            pending_w += w
            if pending_w >= _MERGE_WIDTH:
                _flush()
        else:
            _flush()
            merged.append(f)
    _flush()
    return merged


def concat_forward(modalities, tb=None):
    """Pallas equivalent of Concat.forward: cat([flatten(m, 1) for m], dim=1)."""
    modalities = list(modalities)
    if not modalities:
        raise ValueError("Concat requires at least one modality")

    # Glue: flatten each modality to (B, F_i) — row-major, matches torch.flatten.
    flat = [m.reshape(m.shape[0], -1) for m in modalities]
    B = flat[0].shape[0]
    for f in flat:
        if f.shape[0] != B:
            raise ValueError("all modalities must share the batch dimension")

    out_dtype = jnp.result_type(*[f.dtype for f in flat])

    # Drop zero-width modalities (they contribute nothing).
    flat = [f for f in flat if f.shape[1] > 0]
    if not flat:
        return jnp.zeros((B, 0), out_dtype)

    # Merge runs of adjacent narrow modalities (order preserved).
    flat = _merge_narrow(flat, out_dtype)
    total = sum(f.shape[1] for f in flat)

    # Single-modality fast path: no data movement needed at all.
    if len(flat) == 1:
        return flat[0].astype(out_dtype)

    # Tiny-batch fast path: Pallas launch overhead dominates a sub-vreg copy.
    if B < _MIN_PALLAS_BATCH:
        return jnp.concatenate([f.astype(out_dtype) for f in flat], axis=1)

    vmem_limit, tile_budget = _vmem_budget()

    # VMEM-padding-aware per-row bytes (lane dim padded to 128), x2 for
    # double-buffering of every input tile and the output tile.
    padded_in_row = sum(
        _round_up(f.shape[1], _LANE) * f.dtype.itemsize for f in flat)
    padded_out_row = _round_up(total, _LANE) * jnp.dtype(out_dtype).itemsize
    db_row_bytes = 2 * (padded_in_row + padded_out_row)

    if tb is None:
        tb = _pick_batch_tile(B, db_row_bytes, tile_budget)
    tb = max(_SUBLANE, (tb // _SUBLANE) * _SUBLANE)
    grid = (pl.cdiv(B, tb),)

    # Block shapes: second-to-last dim (tb) is a multiple of 8; last dim equals
    # the full feature width of each array, satisfying the (8, 128) rule.
    in_specs = [pl.BlockSpec((tb, f.shape[1]), lambda i: (i, 0)) for f in flat]
    out_spec = pl.BlockSpec((tb, total), lambda i: (i, 0))

    # Actual HBM traffic (unpadded) for the scheduler hint.
    in_row_bytes = sum(f.shape[1] * f.dtype.itemsize for f in flat)
    out_row_bytes = total * jnp.dtype(out_dtype).itemsize
    bytes_accessed = B * (in_row_bytes + out_row_bytes)

    return pl.pallas_call(
        _concat_kernel,
        out_shape=jax.ShapeDtypeStruct((B, total), out_dtype),
        grid=grid,
        in_specs=in_specs,
        out_specs=out_spec,
        compiler_params=pltpu.CompilerParams(
            dimension_semantics=("parallel",),   # batch tiles are independent
            vmem_limit_bytes=int(vmem_limit),
        ),
        cost_estimate=pl.CostEstimate(
            flops=0, transcendentals=0, bytes_accessed=bytes_accessed),
    )(*flat)


if __name__ == "__main__":
    key = jax.random.PRNGKey(0)
    k1, k2, k3, k4 = jax.random.split(key, 4)

    B = 16
    # Heterogeneous modalities (image-like NCHW, sequence, two narrow vectors).
    x_img = jax.random.normal(k1, (B, 4, 16, 16), dtype=jnp.float32)  # 1024 feats
    x_seq = jax.random.normal(k2, (B, 8, 32), dtype=jnp.float32)      # 256 feats
    x_vec = jax.random.normal(k3, (B, 32), dtype=jnp.float32)         # 32 feats
    x_sml = jax.random.normal(k4, (B, 16), dtype=jnp.float32)         # 16 feats
    mods = [x_img, x_seq, x_vec, x_sml]
    total = 1024 + 256 + 32 + 16

    ref = jnp.concatenate([m.reshape(B, -1) for m in mods], axis=1)

    # Pallas path with an explicit small tile -> grid=(2,), exercises pipelining.
    out = jax.block_until_ready(concat_forward(mods, tb=8))
    assert out.shape == (B, total), out.shape
    assert jnp.allclose(out, ref), "mismatch vs reference concat (tb=8)"

    # Pallas path with auto-selected tile.
    out_auto = jax.block_until_ready(concat_forward(mods))
    assert jnp.allclose(out_auto, ref), "mismatch vs reference concat (auto tb)"

    # Ragged last tile: B not a multiple of the auto-picked tile.
    Br = 13
    mods_r = [m[:Br] for m in mods]
    ref_r = jnp.concatenate([m.reshape(Br, -1) for m in mods_r], axis=1)
    out_r = jax.block_until_ready(concat_forward(mods_r))
    assert out_r.shape == (Br, total), out_r.shape
    assert jnp.allclose(out_r, ref_r), "mismatch vs reference concat (B=13 ragged)"

    # Tiny-batch fallback path preserves the same semantics.
    out_small = jax.block_until_ready(concat_forward([m[:2] for m in mods]))
    assert jnp.allclose(out_small, ref[:2]), "mismatch vs reference concat (B=2)"

    # Single-modality fast path (pure reshape, no kernel launch).
    out_single = jax.block_until_ready(concat_forward([x_img]))
    assert jnp.allclose(out_single, x_img.reshape(B, -1)), "single-modality mismatch"

    print("KERNEL_OK")
</pallas_src>

<mosaic_0001>
module attributes {stable_mosaic.version = 11 : i64} {
  func.func @_concat_kernel(%arg0: i32, %arg1: memref<8x1024xf32, #tpu.memory_space<vmem>>, %arg2: memref<8x256xf32, #tpu.memory_space<vmem>>, %arg3: memref<8x48xf32, #tpu.memory_space<vmem>>, %arg4: memref<8x1328xf32, #tpu.memory_space<vmem>>) attributes {dimension_semantics = [#tpu.dimension_semantics<parallel>], iteration_bounds = array<i64: 2>, scalar_prefetch = 0 : i64, scratch_operands = 0 : i64, tpu.core_type = #tpu.core_type<tc>, window_params = [{transform_indices = @transform_0, window_bounds = array<i64: 8, 1024>}, {transform_indices = @transform_1, window_bounds = array<i64: 8, 256>}, {transform_indices = @transform_2, window_bounds = array<i64: 8, 48>}, {transform_indices = @transform_3, window_bounds = array<i64: 8, 1328>}]} {
    %c0 = arith.constant 0 : index
    %c0_0 = arith.constant 0 : index
    %0 = vector.load %arg1[%c0, %c0_0] : memref<8x1024xf32, #tpu.memory_space<vmem>>, vector<8x1024xf32>
    %c0_1 = arith.constant 0 : index
    %c0_2 = arith.constant 0 : index
    %1 = vector.load %arg4[%c0_1, %c0_2] : memref<8x1328xf32, #tpu.memory_space<vmem>>, vector<8x1024xf32>
    tpu.vector_store %arg4[%c0_1, %c0_2], %0 {strides = array<i32>} : memref<8x1328xf32, #tpu.memory_space<vmem>>, vector<8x1024xf32>,
    %c0_3 = arith.constant 0 : index
    %c0_4 = arith.constant 0 : index
    %2 = vector.load %arg2[%c0_3, %c0_4] : memref<8x256xf32, #tpu.memory_space<vmem>>, vector<8x256xf32>
    %c0_5 = arith.constant 0 : index
    %c1024 = arith.constant 1024 : index
    %3 = vector.load %arg4[%c0_5, %c1024] : memref<8x1328xf32, #tpu.memory_space<vmem>>, vector<8x256xf32>
    tpu.vector_store %arg4[%c0_5, %c1024], %2 {strides = array<i32>} : memref<8x1328xf32, #tpu.memory_space<vmem>>, vector<8x256xf32>,
    %c0_6 = arith.constant 0 : index
    %c0_7 = arith.constant 0 : index
    %4 = vector.load %arg3[%c0_6, %c0_7] : memref<8x48xf32, #tpu.memory_space<vmem>>, vector<8x48xf32>
    %c0_8 = arith.constant 0 : index
    %c1280 = arith.constant 1280 : index
    %5 = vector.load %arg4[%c0_8, %c1280] : memref<8x1328xf32, #tpu.memory_space<vmem>>, vector<8x48xf32>
    tpu.vector_store %arg4[%c0_8, %c1280], %4 {strides = array<i32>} : memref<8x1328xf32, #tpu.memory_space<vmem>>, vector<8x48xf32>,
    return
  }
  func.func @transform_0(%arg0: i32) -> (i32, i32) {
    %c0_i32 = arith.constant 0 : i32
    %c0_i32_0 = arith.constant 0 : i32
    return %arg0, %c0_i32 : i32, i32
  }
  func.func @transform_1(%arg0: i32) -> (i32, i32) {
    %c0_i32 = arith.constant 0 : i32
    %c0_i32_0 = arith.constant 0 : i32
    return %arg0, %c0_i32 : i32, i32
  }
  func.func @transform_2(%arg0: i32) -> (i32, i32) {
    %c0_i32 = arith.constant 0 : i32
    %c0_i32_0 = arith.constant 0 : i32
    return %arg0, %c0_i32 : i32, i32
  }
  func.func @transform_3(%arg0: i32) -> (i32, i32) {
    %c0_i32 = arith.constant 0 : i32
    %c0_i32_0 = arith.constant 0 : i32
    return %arg0, %c0_i32 : i32, i32
  }
}

</mosaic_0001>

<bundles_post_ra>
// kernel: tpu_custom_call.1
= control target key start
LH: loop header
LB: loop body
LE: loop exit
PB: predicated region body
PF: predicated region fallthrough
CT: control target
= control target key end

     0   :  { %8 = vsyncpa [#allocation3], 0  ;;  %s909_s0 = inlined_call_operand.hbm [shape: f32[16,1024], index: 0, kind: input, shape index: {}]   ;;  %s910_s1 = inlined_call_operand.hbm [shape: f32[16,256], index: 1, kind: input, shape index: {}]   ;;  %s911_s2 = inlined_call_operand.hbm [shape: f32[16,48], index: 2, kind: input, shape index: {}]   ;;  %s912_s3 = inlined_call_operand.hbm [shape: f32[16,1328], index: 3, kind: output, shape index: {}]  }
   0x1   :  { %10 = vsyncpa [#allocation3 + $0x1], 0 }
   0x2   :  { %11 = vsyncpa [#allocation6], 0 }
   0x3   :  { %13 = vsyncpa [#allocation6 + $0x1], 0 }
   0x4   :  { %14 = vsyncpa [#allocation4], 0 }
   0x5   :  { %16 = vsyncpa [#allocation4 + $0x1], 0  ;;  %s674_s12 = smov 0   ;;  %s676_s13 = smov 0  }
   0x6   :  { %s678_s14 = smov 0   ;;  %s680_s15 = smov 0  }
   0x7 LB: > { %s695_s16 = sadd.s32 4294967295, %s648_s15   ;;  %s410_s17 = sadd.s32 4294967294, %s648_s15   ;;  %s648_s15 = sphi %s680_s15, %s932_s15   ;;  %s644_s14 = sphi %s678_s14, %s931_s14   ;;  %s640_s13 = sphi %s676_s13, %s930_s13   ;;  %s636_s12 = sphi %s674_s12, %s929_s12  }
   0x8   : > { %s699_s18 = sadd.s32 1, %s648_s15   ;;  %s29_s19 = sadd.s32 1, %s644_s14 }
   0x9   : > { %s26_s20 = ssub.s32 %s648_s15, %s699_s18  ;;  %p36_p0 = scmp.ne.s32.totalorder %s644_s14, %s640_s13 }
   0xa   : > { %p27_p1 = scmp.eq.s32.totalorder %s26_s20, 0  ;;  %p37_p2 = scmp.eq.s32.totalorder %s648_s15, 0 }
   0xb   : > { %p42_p3 = scmp.ne.s32.totalorder %s640_s13, %s636_s12  ;;  %p43_p4 = scmp.eq.s32.totalorder %s695_s16, 0 }
   0xc   : > { %s711_s21 = scalar_select %p27_p1, %s644_s14, %s29_s19  }
   0xd   : > { %p38_p5 = por %p37_p2, %p36_p0  ;;  %p713_p6 = por %p43_p4, %p42_p3 }
   0xe   : > { %p118_p7 = scmp.eq.s32.totalorder %s695_s16, 1  ;;  %p124_p8 = scmp.eq.s32.totalorder %s410_s17, 1 }
   0xf   : > { %s916_s22 = scalar_select %p713_p6, 1, 0 }
  0x10   : > { %p454_p10 = scmp.lt.s32.totalorder %s648_s15, 2  ;;  %p720_p11 = por %p118_p7, %p36_p0 }
  0x11   : > { %p724_p12 = por %p124_p8, %p42_p3  ;;  %s729_s25 = sand.u32 1, %s644_s14  }
  0x12   : > { %s917_s23 = scalar_select %p720_p11, 1, 0 }
  0x13   : > { %s918_s24 = scalar_select %p724_p12, 1, 0 }
  0x14   : > { %p731_p13 = pnand %p454_p10, %p38_p5  ;;  %s163_s27 = sand.u32 1, %s648_s15  }
  0x15   : > { %s416_s28 = sshll.u32 %s729_s25, 4  ;;  %s429_s29 = sshll.u32 %s648_s15, 8 }
  0x16   : > { %s919_s26 = scalar_select %p731_p13, 1, 0 }
  0x17   : > { %s741_s5 = scalar_lea.hbm %s910_s1, %s429_s29  ;;  %s167_s6 = scalar_lea.vmem [#allocation5], %s416_s28 }
  0x18   : > { %s175_s7 = sshll.u32 %s167_s6, 4  ;;  %s746_s8 = scalar_lea.sflag [#allocation6], %s163_s27  ;;  %s743_s7 = int_to_ptr.vmem [resolvable:$true] %s175_s7 }
  0x19   : > { %s488_s9 = scalar_lea.hbm %s741_s5, 256  ;;  %p752_p2 = pneg %p731_p13 }
  0x1a   : > { %p489_p1 = scmp.ne.s32.totalorder %s741_s5, %s488_s9  ;;  %s493_s19 = scalar_lea.hbm %s910_s1, 512 }
  0x1b   : > { %p494_p5 = scmp.lt.u32.totalorder %s741_s5, %s910_s1  ;;  %p495_p7 = scmp.lt.u32.totalorder %s493_s19, %s488_s9 }
  0x1c   : > { %p491_p3 = pnand %p752_p2, %p489_p1  ;;  %p497_p10 = scmp.lt.u32.totalorder %s488_s9, %s741_s5 }
  0x1d   : > { %p496_p8 = por %p495_p7, %p494_p5 }
  0x1e   : > { %p492_p4 = pneg %p491_p3 }
  0x1f   : > { %p498_p9 = por %p497_p10, %p496_p8 }
  0x21   : > { %p499_p0 = pnand %p498_p9, %p492_p4 }
  0x23   : > { %502 = shalt.err (!%p499_p0)
}
  0x24   : > { %s503_s27 = scalar_lea.vmem %s743_s7, 256  ;;  %s650_s29 = smov [#allocation5]  }
  0x25   : > { %p504_p1 = scmp.ne.s32.totalorder %s743_s7, %s503_s27  ;;  %s508_s30 = sshll.u32 %s650_s29, 4  ;;  %s509_s30 = int_to_ptr.vmem [resolvable:$false] %s508_s30 }
  0x26   : > { %s510_s4 = scalar_lea.vmem %s509_s30, 512  ;;  %p511_p11 = scmp.lt.s32.totalorder %s743_s7, %s509_s30 }
  0x27   : > { %p506_p3 = pnand %p504_p1, %p752_p2  ;;  %p512_p6 = scmp.lt.s32.totalorder %s510_s4, %s503_s27 }
  0x29   : > { %p507_p12 = pneg %p506_p3  ;;  %p513_p5 = por %p512_p6, %p511_p11 }
  0x2b   : > { %p514_p7 = pnand %p513_p5, %p507_p12 }
  0x2d   : > { %517 = shalt.err (!%p514_p7)
}
  0x2e   : > { %446 = dma.hbm_to_vmem [thread:$0]  (!%p731_p13), %s741_s5, 256, %s743_s7, %s746_s8  }
  0x2f   : > { %p198_p9 = scmp.lt.s32.totalorder %s648_s15, 3  ;;  %s413_s6 = sshll.u32 %s729_s25, 6 }
  0x30   : > { %s428_s9 = sshll.u32 %s648_s15, 10  ;;  %p921_p0 = scmp.ge.s32.totalorder %s648_s15, 1 }
  0x31   : > { %s788_s20 = scalar_lea.hbm %s909_s0, %s428_s9  ;;  %s148_s28 = scalar_lea.vmem [#allocation2], %s413_s6 }
  0x32   : > { %p781_p6 = pnand %p921_p0, %p198_p9  ;;  %s156_s27 = sshll.u32 %s148_s28, 4  ;;  %s790_s27 = int_to_ptr.vmem [resolvable:$true] %s156_s27 }
  0x33   : > { %s419_s5 = sshll.u32 %s729_s25, 3  ;;  %s145_s7 = scalar_lea.sflag [#allocation3], %s729_s25 }
  0x34   : > { %s922_s11 = scalar_select %p781_p6, 1, 0 }
  0x35   : > { %s518_s29 = scalar_lea.hbm %s788_s20, 1024  ;;  %s523_s9 = scalar_lea.hbm %s909_s0, 2048 }
  0x36   : > { %p519_p11 = scmp.ne.s32.totalorder %s788_s20, %s518_s29  ;;  %p524_p8 = scmp.lt.u32.totalorder %s788_s20, %s909_s0 }
  0x37   : > { %p525_p10 = scmp.lt.u32.totalorder %s523_s9, %s518_s29  ;;  %p527_p3 = scmp.lt.u32.totalorder %s518_s29, %s788_s20 }
  0x38   : > { %p521_p12 = pnand %p519_p11, %p752_p2 }
  0x39   : > { %p526_p1 = por %p525_p10, %p524_p8 }
  0x3a   : > { %p522_p4 = pneg %p521_p12 }
  0x3b   : > { %p528_p5 = por %p527_p3, %p526_p1 }
  0x3d   : > { %p529_p7 = pnand %p528_p5, %p522_p4 }
  0x3f   : > { %532 = shalt.err (!%p529_p7)
}
  0x40   : > { %s533_s6 = scalar_lea.vmem %s790_s27, 1024  ;;  %s651_s28 = smov [#allocation2]  }
  0x41   : > { %p534_p9 = scmp.ne.s32.totalorder %s790_s27, %s533_s6  ;;  %s538_s30 = sshll.u32 %s651_s28, 4  ;;  %s539_s30 = int_to_ptr.vmem [resolvable:$false] %s538_s30 }
  0x42   : > { %s540_s4 = scalar_lea.vmem %s539_s30, 2048  ;;  %p541_p12 = scmp.lt.s32.totalorder %s790_s27, %s539_s30 }
  0x43   : > { %p536_p0 = pnand %p534_p9, %p752_p2  ;;  %p542_p6 = scmp.lt.s32.totalorder %s540_s4, %s533_s6 }
  0x45   : > { %p537_p11 = pneg %p536_p0  ;;  %p543_p8 = por %p542_p6, %p541_p12 }
  0x47   : > { %p544_p10 = pnand %p543_p8, %p537_p11 }
  0x49   : > { %547 = shalt.err (!%p544_p10)
}
  0x4a   : > { %443 = dma.hbm_to_vmem [thread:$0]  (!%p731_p13), %s788_s20, 1024, %s790_s27, %s145_s7  }
  0x4b   : > { %s420_s29 = sshll.u32 %s648_s15, 7  ;;  %s186_s6 = scalar_lea.vmem [#allocation7], %s419_s5 }
  0x4c   : > { %s819_s19 = scalar_lea.hbm %s911_s2, %s420_s29  ;;  %s193_s28 = sshll.u32 %s186_s6, 4  ;;  %s194_s28 = int_to_ptr.vmem [resolvable:$true] %s193_s28 }
  0x4d   : > { %s548_s30 = scalar_lea.hbm %s819_s19, 128  ;;  %s553_s7 = scalar_lea.hbm %s911_s2, 256 }
  0x4e   : > { %p549_p6 = scmp.ne.s32.totalorder %s819_s19, %s548_s30  ;;  %p554_p3 = scmp.lt.u32.totalorder %s819_s19, %s911_s2 }
  0x4f   : > { %p555_p5 = scmp.lt.u32.totalorder %s553_s7, %s548_s30  ;;  %p557_p9 = scmp.lt.u32.totalorder %s548_s30, %s819_s19 }
  0x50   : > { %p551_p4 = pnand %p549_p6, %p752_p2 }
  0x51   : > { %p556_p7 = por %p555_p5, %p554_p3 }
  0x52   : > { %p552_p1 = pneg %p551_p4 }
  0x53   : > { %p558_p0 = por %p557_p9, %p556_p7 }
  0x55   : > { %p559_p11 = pnand %p558_p0, %p552_p1 }
  0x57   : > { %562 = shalt.err (!%p559_p11)
}
  0x58   : > { %s563_s25 = scalar_lea.vmem %s194_s28, 128  ;;  %s652_s5 = smov [#allocation7]  }
  0x59   : > { %p564_p12 = scmp.ne.s32.totalorder %s194_s28, %s563_s25  ;;  %s568_s9 = sshll.u32 %s652_s5, 4  ;;  %s569_s9 = int_to_ptr.vmem [resolvable:$false] %s568_s9 }
  0x5a   : > { %s570_s17 = scalar_lea.vmem %s569_s9, 256  ;;  %p571_p6 = scmp.lt.s32.totalorder %s194_s28, %s569_s9 }
  0x5b   : > { %p566_p8 = pnand %p564_p12, %p752_p2  ;;  %p572_p4 = scmp.lt.s32.totalorder %s570_s17, %s563_s25 }
  0x5d   : > { %p567_p10 = pneg %p566_p8  ;;  %p573_p13 = por %p572_p4, %p571_p6 }
  0x5f   : > { %p574_p3 = pnand %p573_p13, %p567_p10 }
  0x61   : > { %577 = shalt.err (!%p574_p3)
}
  0x62   : > { %p923_p5 = scmp.ne.s32.totalorder %s919_s26, 0  ;;  %p924_p1 = scmp.ne.s32.totalorder %s922_s11, 0 }
  0x63   : > { %s844_s10 = sand.u32 (!%p924_p1), 1, %s640_s13   ;;  %p925_p2 = scmp.ne.s32.totalorder (!%p924_p1), %s916_s22, 0 }
  0x64   : > { %449 = dma.hbm_to_vmem [thread:$0]  (!%p923_p5), %s819_s19, 128, %s194_s28, %s746_s8  }
  0x65   : > { %202 = sbr.rel (%p924_p1) target bundleno = 139 (0x8b), region = 32  ;;  %s422_s6 = sshll.u32 (!%p924_p1), %s844_s10, 6 }
  0x66   : > { %s205_s30 = scalar_lea.sflag (!%p924_p1), [#allocation3], %s844_s10  ;;  %s208_s20 = scalar_lea.vmem (!%p924_p1), [#allocation2], %s422_s6 }
  0x6c   : > { %623 = dma.done.wait (%p925_p2), %s205_s30, 1024  }
  0x6d   : > { %625 = vsyncadd (%p925_p2), %s205_s30, 4294966272  ;;  %s213_s26 = sand.u32 1, %s695_s16   ;;  %s423_s8 = sshll.u32 %s844_s10, 4 }
  0x6e   : > { %s214_s11 = scalar_lea.sflag [#allocation6], %s213_s26  ;;  %s217_s19 = scalar_lea.vmem [#allocation5], %s423_s8 }
  0x6f   : > { %627 = dma.done.wait (%p925_p2), %s214_s11, 384  }
  0x70   : > { %629 = vsyncadd (%p925_p2), %s214_s11, 4294966912  ;;  %s430_s28 = smul.u32 88, %s844_s10  ;;  %s424_s27 = sshll.u32 %s844_s10, 3  ;;  %v259_v0 = vld [vmem:[%s208_s20] sm:$0xff]  ;;  %v260_v1 = vld [vmem:[%s208_s20 + $0x8] sm:$0xff]  ;;  %vm280_vm0 = vcmask 392192  }
  0x71   : > { %s431_s7 = smul.u32 1408, %s695_s16  ;;  %v261_v2 = vld [vmem:[%s208_s20 + $0x10] sm:$0xff]  ;;  %v262_v3 = vld [vmem:[%s208_s20 + $0x18] sm:$0xff]  ;;  %v263_v4 = vld [vmem:[%s208_s20 + $0x20] sm:$0xff]  ;;  %s226_s5 = scalar_lea.vmem [#allocation7], %s424_s27 }
  0x72   : > { %s258_s4 = scalar_lea.vmem [#allocation8], %s430_s28  ;;  %v264_v5 = vld [vmem:[%s208_s20 + $0x28] sm:$0xff]  ;;  %v265_v6 = vld [vmem:[%s208_s20 + $0x30] sm:$0xff]  ;;  %v266_v7 = vld [vmem:[%s208_s20 + $0x38] sm:$0xff]  ;;  %s283_s9 = scalar_lea.sflag [#allocation4], %s844_s10 }
  0x73   : > { %s297_s29 = sshll.u32 %s258_s4, 4  ;;  %267 = vst [vmem:[%s258_s4] sm:$0xff] %v259_v0  ;;  %268 = vst [vmem:[%s258_s4 + $0x8] sm:$0xff] %v260_v1  ;;  %v275_v8 = vld [vmem:[%s217_s19] sm:$0xff]  ;;  %s864_s25 = scalar_lea.hbm %s912_s3, %s431_s7  ;;  %v276_v9 = vld [vmem:[%s217_s19 + $0x8] sm:$0xff]  ;;  %s866_s29 = int_to_ptr.vmem [resolvable:$true] %s297_s29 }
  0x74   : > { %269 = vst [vmem:[%s258_s4 + $0x10] sm:$0xff] %v261_v2  ;;  %270 = vst [vmem:[%s258_s4 + $0x18] sm:$0xff] %v262_v3  ;;  %v279_v10 = vld [vmem:[%s226_s5] sm:$0xff]  ;;  %s578_s17 = scalar_lea.vmem %s866_s29, 1408  ;;  %p926_p7 = scmp.ne.s32.totalorder %s917_s23, 0 }
  0x75   : > { %271 = vst [vmem:[%s258_s4 + $0x20] sm:$0xff] %v263_v4  ;;  %272 = vst [vmem:[%s258_s4 + $0x28] sm:$0xff] %v264_v5  ;;  %p579_p13 = scmp.ne.s32.totalorder %s866_s29, %s578_s17  ;;  %s653_s6 = smov [#allocation8]  }
  0x76   : > { %273 = vst [vmem:[%s258_s4 + $0x30] sm:$0xff] %v265_v6  ;;  %274 = vst [vmem:[%s258_s4 + $0x38] sm:$0xff] %v266_v7  ;;  %s582_s30 = sshll.u32 %s653_s6, 4  ;;  %s583_s30 = int_to_ptr.vmem [resolvable:$false] %s582_s30 }
  0x77   : > { %277 = vst [vmem:[%s258_s4 + $0x40] sm:$0xff] %v275_v8  ;;  %278 = vst [vmem:[%s258_s4 + $0x48] sm:$0xff] %v276_v9  ;;  %p580_p9 = pnand %p579_p13, %p926_p7  ;;  %s584_s20 = scalar_lea.vmem %s583_s30, 2816 }
  0x78   : > { %281 = vst.msk [vmem:[%s258_s4 + $0x50] sm:$0xff] %vm280_vm0, %v279_v10  ;;  %p585_p11 = scmp.lt.s32.totalorder %s866_s29, %s583_s30  ;;  %p586_p12 = scmp.lt.s32.totalorder %s584_s20, %s578_s17 }
  0x79   : > { %p581_p0 = pneg %p580_p9 }
  0x7a   : > { %p587_p8 = por %p586_p12, %p585_p11 }
  0x7c   : > { %p588_p10 = pnand %p587_p8, %p581_p0 }
  0x7e   : > { %591 = shalt.err (!%p588_p10)
}
  0x7f   : > { %s592_s10 = scalar_lea.hbm %s864_s25, 1408  ;;  %s596_s11 = scalar_lea.hbm %s912_s3, 2816 }
  0x80   : > { %p593_p6 = scmp.ne.s32.totalorder %s864_s25, %s592_s10  ;;  %p597_p5 = scmp.lt.u32.totalorder %s864_s25, %s912_s3 }
  0x81   : > { %p598_p1 = scmp.lt.u32.totalorder %s596_s11, %s592_s10  ;;  %p600_p13 = scmp.lt.u32.totalorder %s592_s10, %s864_s25 }
  0x82   : > { %p594_p4 = pnand %p593_p6, %p926_p7 }
  0x83   : > { %p599_p2 = por %p598_p1, %p597_p5 }
  0x84   : > { %p595_p3 = pneg %p594_p4 }
  0x85   : > { %p601_p9 = por %p600_p13, %p599_p2 }
  0x87   : > { %p602_p0 = pnand %p601_p9, %p595_p3 }
  0x89   : > { %605 = shalt.err (!%p602_p0)
}
  0x8a   : > { %438 = dma.vmem_to_hbm [thread:$0]  (%p926_p7), %s866_s29, 1408, %s864_s25, %s283_s9  }
  0x8b PF: > { %s309_s27 = sand.u32 1, %s636_s12   ;;  %p927_p11 = scmp.ne.s32.totalorder %s918_s24, 0 }
  0x8c   : > { %p928_p12 = scmp.ge.s32.totalorder %s648_s15, 2  ;;  %s310_s7 = scalar_lea.sflag [#allocation4], %s309_s27 }
  0x8e   : > { %p451_p8 = pnand %p928_p12, %p927_p11 }
  0x90   : > { %631 = dma.done.wait (!%p451_p8), %s310_s7, 1408  }
  0x91   : > { %633 = vsyncadd (!%p451_p8), %s310_s7, 4294965888  ;;  %p19_p10 = scmp.ge.s32.totalorder %s699_s18, 4   ;;  %s929_s12 = smov %s640_s13 }
  0x92   : > { %s930_s13 = smov %s644_s14  ;;  %s931_s14 = smov %s711_s21 }
  0x93   : > { %s932_s15 = smov %s699_s18  ;;  %21 = sbr.rel (!%p19_p10) target bundleno = 7 (0x7), region = 101 }
  0x9a   :  { %315 = vsyncpa [#allocation3], 1 }
  0x9b   :  { %317 = vsyncpa [#allocation3 + $0x1], 1 }
  0x9c   :  { %318 = vsyncpa [#allocation6], 1 }
  0x9d   :  { %320 = vsyncpa [#allocation6 + $0x1], 1 }
  0x9e   :  { %321 = vsyncpa [#allocation4], 1 }
  0x9f   :  { %323 = vsyncpa [#allocation4 + $0x1], 1 }

</bundles_post_ra>
